<compile_context>
chip_gen: v7x
topology: tpu7x:2x2x1
jax: 0.10.0
libtpu: 0.0.40
codegen_flags: <defaults>
</compile_context>

<pallas_src>
import jax
import jax.numpy as jnp
from jax.experimental import pallas as pl
from jax.experimental.pallas import tpu as pltpu


def toy_kernel(p_ref, o_ref):
    # p_ref: SMEM ref of shape (4,)  -- the flattened pose3d parameter
    # o_ref: SMEM ref of shape (1,)  -- the scalar result
    p0 = p_ref[0]
    p1 = p_ref[1]
    p2 = p_ref[2]
    p3 = p_ref[3]
    p0sq = p0 * p0
    o_ref[0] = p3 * p3 + p2 * p1 * p0 + p0sq * p0sq


def toy_example_forward(pose3d):
    """pose3d: jnp.float32 array of shape (4, 1). Returns shape (1,) float32.

    Note: if this op ever sits in a hot path, prefer computing the expression
    in plain jax.numpy (XLA fuses it for free); the Pallas call exists only to
    satisfy the kernel requirement.
    """
    pose_flat = pose3d.reshape(4)  # keep SMEM ref 1-D; no dtype convert needed
    out = pl.pallas_call(
        toy_kernel,
        out_shape=jax.ShapeDtypeStruct((1,), jnp.float32),
        in_specs=[pl.BlockSpec(memory_space=pltpu.MemorySpace.SMEM)],
        out_specs=pl.BlockSpec(memory_space=pltpu.MemorySpace.SMEM),
        cost_estimate=pl.CostEstimate(
            flops=6, bytes_accessed=20, transcendentals=0
        ),
    )(pose_flat)
    return out


if __name__ == "__main__":
    # Deterministic "init_pose3d"-style initialization of the (4, 1) parameter.
    key = jax.random.PRNGKey(0)
    pose3d = jax.random.normal(key, (4, 1), dtype=jnp.float32)

    result = jax.block_until_ready(toy_example_forward(pose3d))

    # Pure-JAX reference of the PyTorch forward semantics.
    ref = pose3d[3] ** 2 + pose3d[2] * pose3d[1] * pose3d[0] + pose3d[0] ** 4
    ref = ref.reshape(1)

    assert result.shape == (1,)
    assert result.dtype == jnp.float32
    assert jnp.allclose(result, ref, rtol=1e-5, atol=1e-6)

    print("KERNEL_OK")
</pallas_src>

<mosaic_0001>
module attributes {stable_mosaic.version = 11 : i64} {
  func.func @toy_kernel(%arg0: memref<4xf32, #tpu.memory_space<smem>>, %arg1: memref<1xf32, #tpu.memory_space<smem>>) attributes {dimension_semantics = [], scalar_prefetch = 0 : i64, scratch_operands = 0 : i64, tpu.core_type = #tpu.core_type<tc>} {
    %c0 = arith.constant 0 : index
    %0 = memref.load %arg0[%c0] : memref<4xf32, #tpu.memory_space<smem>>
    %c1 = arith.constant 1 : index
    %1 = memref.load %arg0[%c1] : memref<4xf32, #tpu.memory_space<smem>>
    %c2 = arith.constant 2 : index
    %2 = memref.load %arg0[%c2] : memref<4xf32, #tpu.memory_space<smem>>
    %c3 = arith.constant 3 : index
    %3 = memref.load %arg0[%c3] : memref<4xf32, #tpu.memory_space<smem>>
    %4 = arith.mulf %0, %0 : f32
    %5 = arith.mulf %3, %3 : f32
    %6 = arith.mulf %2, %1 : f32
    %7 = arith.mulf %6, %0 : f32
    %8 = arith.addf %5, %7 : f32
    %9 = arith.mulf %4, %4 : f32
    %10 = arith.addf %8, %9 : f32
    %c0_0 = arith.constant 0 : index
    %11 = memref.load %arg1[%c0_0] : memref<1xf32, #tpu.memory_space<smem>>
    memref.store %10, %arg1[%c0_0] : memref<1xf32, #tpu.memory_space<smem>>
    return
  }
}

</mosaic_0001>

<bundles_post_ra>
// kernel: tpu_custom_call.1
= control target key start
LH: loop header
LB: loop body
LE: loop exit
PB: predicated region body
PF: predicated region fallthrough
CT: control target
= control target key end

     0   :  { %6 = vsyncpa [#allocation3], 0  ;;  %s112_s0 = inlined_call_operand.hbm [shape: f32[4], index: 0, kind: input, shape index: {}]   ;;  %s113_s1 = inlined_call_operand.hbm [shape: f32[1], index: 1, kind: output, shape index: {}]  }
   0x1   :  { %7 = vsyncpa [#allocation4], 0  ;;  %s52_s8 = scalar_lea.hbm %s112_s0, 16 }
   0x2   :  { %p53_p0 = scmp.ne.s32.totalorder %s112_s0, %s52_s8  ;;  %p56_p1 = scmp.lt.u32.totalorder %s52_s8, %s112_s0 }
   0x4   :  { %p58_p2 = pnand %p56_p1, %p53_p0 }
   0x6   :  { %61 = shalt.err (!%p58_p2)
}
   0x7   :  { %s76_s13 = smov [#allocation2]  }
   0x8   :  { %15 = dma.hbm_to_smem %s112_s0, 16, %s76_s13, [#allocation3]  }
   0x9   :  { %72 = dma.done.wait [#allocation3], 16  }
   0xa   :  { %73 = vsyncadd [#allocation3], 4294967280 }
   0xb   :  { %19 = sfence }
   0xc   :  { %s20_s16 = sld [smem:[#allocation2]]  ;;  %s47_s17 = sld [smem:[#allocation2 + $0x1]] }
   0xd   :  { %s48_s18 = sld [smem:[#allocation2 + $0x2]]  ;;  %s49_s19 = sld [smem:[#allocation2 + $0x3]] }
   0xe   :  { %s62_s29 = scalar_lea.hbm %s113_s1, 16 }
   0xf   :  { %p63_p3 = scmp.ne.s32.totalorder %s113_s1, %s62_s29  ;;  %p66_p4 = scmp.lt.u32.totalorder %s62_s29, %s113_s1 }
  0x11   :  { %p68_p5 = pnand %p66_p4, %p63_p3 }
  0x12   :  { %s24_s20 = smul.f32 %s20_s16, %s20_s16 }
  0x13   :  { %s25_s21 = smul.f32 %s49_s19, %s49_s19 }
  0x14   :  { %s26_s22 = smul.f32 %s48_s18, %s47_s17 }
  0x15   :  { %s29_s23 = smul.f32 %s24_s20, %s24_s20 }
  0x16   :  { %s27_s24 = smul.f32 %s26_s22, %s20_s16 }
  0x18   :  { %s28_s25 = sadd.f32 %s27_s24, %s25_s21 }
  0x1a   :  { %s30_s26 = sadd.f32 %s29_s23, %s28_s25 }
  0x1c   :  { %32 = sst [smem:[#allocation5]] %s30_s26 }
  0x1d   :  { %71 = shalt.err (!%p68_p5)
}
  0x1e   :  { %s77_s4 = smov [#allocation5]  }
  0x1f   :  { %40 = dma.smem_to_hbm %s77_s4, 16, %s113_s1, [#allocation4]  }
  0x20   :  { %74 = dma.done.wait [#allocation4], 16  }
  0x21   :  { %75 = vsyncadd [#allocation4], 4294967280 }
  0x22   :  { %44 = sfence }
  0x23   :  { %45 = vsyncpa [#allocation3], 1 }
  0x24   :  { %46 = vsyncpa [#allocation4], 1 }

</bundles_post_ra>
